<compile_context>
chip_gen: v7x
topology: tpu7x:2x2x1
jax: 0.10.0
libtpu: 0.0.40
codegen_flags: <defaults>
</compile_context>

<pallas_src>
import jax
import jax.numpy as jnp
from jax import lax
from jax.experimental import pallas as pl
from jax.experimental.pallas import tpu as pltpu


_VMEM_LIMIT = 48 * 1024 * 1024   # explicit scoped-VMEM cap (< 64 MiB physical on v7x)


def _round_up(x, m):
    return (x + m - 1) // m * m


def _pick_tm(m_rows, bytes_per_row, budget=24 << 20):
    """Largest power-of-two row tile (8..1024) whose double-buffered A+O tiles fit
    `budget`, shrunk until the grid has >= 2 steps (megacore sharding) when M allows."""
    tm = 1024
    while tm > 8 and 2 * tm * bytes_per_row > budget:
        tm //= 2
    while tm > 8 and pl.cdiv(m_rows, tm) < 2:
        tm //= 2
    return tm


# ----------------------------------------------------------------------------
# Stage 1 Pallas kernel: dense ConvTranspose tap GEMM  (M, C) @ (C, 16C)
# ----------------------------------------------------------------------------
def _upconv_gemm_kernel(a_ref, w_ref, o_ref):
    # a_ref: (tm, C) bf16   w_ref: (C, 16C) bf16   o_ref: (tm, 16C) f32
    o_ref[...] = jnp.dot(a_ref[...], w_ref[...],
                         preferred_element_type=jnp.float32)


def upconv_tap_gemm(a, w):
    """a: (M, C) f32, w: (C, 16C) f32 -> (M, 16C) f32. Lane-dense 16C-wide output."""
    M, K = a.shape
    Nc = w.shape[1]
    a16 = a.astype(jnp.bfloat16)            # bf16 MXU inputs, f32 accumulation
    w16 = w.astype(jnp.bfloat16)
    tm = _pick_tm(M, K * 2 + Nc * 4)
    Mp = _round_up(M, tm)
    if Mp != M:                             # pad rows (no single-step tm = M fallback)
        a16 = jnp.pad(a16, ((0, Mp - M), (0, 0)))
    out = pl.pallas_call(
        _upconv_gemm_kernel,
        out_shape=jax.ShapeDtypeStruct((Mp, Nc), jnp.float32),
        grid=(Mp // tm,),
        in_specs=[
            pl.BlockSpec((tm, K), lambda i: (i, 0)),
            pl.BlockSpec((K, Nc), lambda i: (0, 0)),   # constant index -> fetched once
        ],
        out_specs=pl.BlockSpec((tm, Nc), lambda i: (i, 0)),
        compiler_params=pltpu.CompilerParams(
            dimension_semantics=("parallel",),
            vmem_limit_bytes=_VMEM_LIMIT,
        ),
    )(a16, w16)
    return out[:M]


# ----------------------------------------------------------------------------
# Stage 2 Pallas kernel: fused cat + Conv2d(2C -> C, k=3, s=1, p=1)
#   grid = (n, y, ky); ky is the reduction ("arbitrary") axis with a VMEM accumulator;
#   the ky shift is expressed in the input index_map (size-1 row blocks of the padded
#   NHWC tensors), the kx shifts are static slices of the (Wo+2)-wide VMEM row.
# ----------------------------------------------------------------------------
def _fused_cat_conv3_kernel(up_ref, x2_ref, wa_ref, wb_ref, b_ref, o_ref, acc_ref):
    # up_ref/x2_ref: (1, 1, Wo+2, C) bf16 padded row y+ky
    # wa_ref/wb_ref: (3, 3, C, C)   = (ky, kx, ci, co), bf16, VMEM-resident
    # b_ref: (1, C) f32   o_ref: (1, 1, Wo, C) f32   acc_ref: (Wo, C) f32 scratch
    k = pl.program_id(2)
    wo = o_ref.shape[2]

    @pl.when(k == 0)
    def _init():
        acc_ref[...] = jnp.zeros_like(acc_ref)

    up_row = up_ref[0, 0]                 # (Wo+2, C)
    x2_row = x2_ref[0, 0]
    acc = acc_ref[...]
    for kx in range(3):                   # static unroll: kx shift = VMEM slice, no im2col
        acc = acc + jnp.dot(up_row[kx:kx + wo, :], wa_ref[k, kx],
                            preferred_element_type=jnp.float32)
        acc = acc + jnp.dot(x2_row[kx:kx + wo, :], wb_ref[k, kx],
                            preferred_element_type=jnp.float32)
    acc_ref[...] = acc

    @pl.when(k == pl.num_programs(2) - 1)
    def _finalize():
        o_ref[0, 0] = acc_ref[...] + b_ref[...]


def fused_cat_conv3x3(up, x2_nhwc, w2, b2):
    """Conv2d(cat([up, x2], ch)) with 2C->C, k=3, p=1 — concat and im2col never built.

    up, x2_nhwc: (N, Ho, Wo, C). w2: (C, 2C, 3, 3) OIHW. b2: (C,). -> (N, Ho, Wo, C) f32.
    """
    N, Ho, Wo, C = up.shape
    # split the 2C input channels: first C act on `up`, last C on `x2` (torch.cat order)
    wa = jnp.transpose(w2[:, :C], (2, 3, 1, 0)).astype(jnp.bfloat16)   # (ky, kx, ci, co)
    wb = jnp.transpose(w2[:, C:], (2, 3, 1, 0)).astype(jnp.bfloat16)
    up_p = jnp.pad(up.astype(jnp.bfloat16), ((0, 0), (1, 1), (1, 1), (0, 0)))
    x2_p = jnp.pad(x2_nhwc.astype(jnp.bfloat16), ((0, 0), (1, 1), (1, 1), (0, 0)))
    b2r = b2.reshape(1, C).astype(jnp.float32)

    row_spec = pl.BlockSpec((1, 1, Wo + 2, C), lambda n, y, k: (n, y + k, 0, 0))
    w_spec = pl.BlockSpec((3, 3, C, C), lambda n, y, k: (0, 0, 0, 0))   # constant -> 1 DMA
    return pl.pallas_call(
        _fused_cat_conv3_kernel,
        out_shape=jax.ShapeDtypeStruct((N, Ho, Wo, C), jnp.float32),
        grid=(N, Ho, 3),                   # ky tap axis last (reduction)
        in_specs=[row_spec, row_spec, w_spec, w_spec,
                  pl.BlockSpec((1, C), lambda n, y, k: (0, 0))],
        out_specs=pl.BlockSpec((1, 1, Wo, C), lambda n, y, k: (n, y, 0, 0)),
        scratch_shapes=[pltpu.VMEM((Wo, C), jnp.float32)],
        compiler_params=pltpu.CompilerParams(
            dimension_semantics=("parallel", "parallel", "arbitrary"),
            vmem_limit_bytes=_VMEM_LIMIT,
        ),
    )(up_p, x2_p, wa, wb, b2r)


# ----------------------------------------------------------------------------
# UpSampleAdd forward
# ----------------------------------------------------------------------------
def upsample_add_forward(x1, x2, params):
    """
    x1: (N, C, H, W), x2: (N, C, 2H, 2W) — NCHW float32 (PyTorch interface).
    params: w_up (C, C, 4, 4) [ConvTranspose2d (in,out,kH,kW)], b_up (C,),
            w2 (C, 2C, 3, 3) [Conv2d (out,in,kH,kW)], b2 (C,).
    returns (N, C, 2H, 2W) NCHW float32.
    """
    w_up, b_up, w2, b2 = params["w_up"], params["b_up"], params["w2"], params["b2"]
    N, C, H, W = x1.shape
    Ho, Wo = 2 * H, 2 * W

    # NCHW -> NHWC (interface glue only)
    x1_nhwc = jnp.transpose(x1, (0, 2, 3, 1))
    x2_nhwc = jnp.transpose(x2, (0, 2, 3, 1))

    # ---- ConvTranspose2d(k=4, s=2, p=1): dense tap GEMM + overlap-add --------------
    # contrib[n, iy, ix, ky, kx, co] = sum_ci x1[n, iy, ix, ci] * w_up[ci, co, ky, kx]
    a = x1_nhwc.reshape(N * H * W, C)
    w_gemm = jnp.transpose(w_up, (0, 2, 3, 1)).reshape(C, 16 * C)   # (ci, (ky, kx, co))
    contrib = upconv_tap_gemm(a, w_gemm).reshape(N, H, W, 4, 4, C)

    # overlap-add: out row 2p   <- (iy=p,   ky=1) + (iy=p-1, ky=3)
    #              out row 2p+1 <- (iy=p+1, ky=0) + (iy=p,   ky=2)    (same along W)
    cp = jnp.pad(contrib, ((0, 0), (1, 1), (1, 1), (0, 0), (0, 0), (0, 0)))
    r_even = cp[:, 1:H + 1, :, 1] + cp[:, 0:H, :, 3]      # (N, H, W+2, 4, C)
    r_odd = cp[:, 2:H + 2, :, 0] + cp[:, 1:H + 1, :, 2]

    def _cols(r):
        return (r[:, :, 1:W + 1, 1] + r[:, :, 0:W, 3],
                r[:, :, 2:W + 2, 0] + r[:, :, 1:W + 1, 2])

    u00, u01 = _cols(r_even)
    u10, u11 = _cols(r_odd)
    up = jnp.stack([jnp.stack([u00, u01], axis=3),        # (N, H, 2, W, 2, C)
                    jnp.stack([u10, u11], axis=3)], axis=2)
    up = up.reshape(N, Ho, Wo, C) + b_up[None, None, None, :]

    # ---- fused concat + Conv2d(2C -> C, k=3, s=1, p=1) ------------------------------
    out = fused_cat_conv3x3(up, x2_nhwc, w2, b2)          # (N, Ho, Wo, C) f32

    return jnp.transpose(out, (0, 3, 1, 2))               # back to NCHW


# ----------------------------------------------------------------------------
# Pure-JAX reference (lax convs) for verification
# ----------------------------------------------------------------------------
def reference_forward(x1, x2, params):
    w_up, b_up, w2, b2 = params["w_up"], params["b_up"], params["w2"], params["b2"]
    up = lax.conv_general_dilated(
        x1, jnp.flip(w_up, axis=(2, 3)),
        window_strides=(1, 1), padding=((2, 2), (2, 2)), lhs_dilation=(2, 2),
        dimension_numbers=("NCHW", "IOHW", "NCHW"),
    ) + b_up[None, :, None, None]
    cat = jnp.concatenate([up, x2], axis=1)
    out = lax.conv_general_dilated(
        cat, w2, window_strides=(1, 1), padding=((1, 1), (1, 1)),
        dimension_numbers=("NCHW", "OIHW", "NCHW"),
    ) + b2[None, :, None, None]
    return out


# ----------------------------------------------------------------------------
# Main
# ----------------------------------------------------------------------------
if __name__ == "__main__":
    key = jax.random.PRNGKey(0)
    k_x1, k_x2, k_wu, k_bu, k_w2, k_b2 = jax.random.split(key, 6)

    N, C, H, W = 2, 4, 8, 8
    x1 = jax.random.normal(k_x1, (N, C, H, W), jnp.float32)
    x2 = jax.random.normal(k_x2, (N, C, 2 * H, 2 * W), jnp.float32)

    # Deterministic parameter init (shapes follow the PyTorch module's __init__).
    fan_up = C * 4 * 4
    fan_c2 = 2 * C * 3 * 3
    params = {
        "w_up": jax.random.uniform(k_wu, (C, C, 4, 4), jnp.float32,
                                   -1.0 / fan_up ** 0.5, 1.0 / fan_up ** 0.5),
        "b_up": jax.random.uniform(k_bu, (C,), jnp.float32,
                                   -1.0 / fan_up ** 0.5, 1.0 / fan_up ** 0.5),
        "w2": jax.random.uniform(k_w2, (C, 2 * C, 3, 3), jnp.float32,
                                 -1.0 / fan_c2 ** 0.5, 1.0 / fan_c2 ** 0.5),
        "b2": jax.random.uniform(k_b2, (C,), jnp.float32,
                                 -1.0 / fan_c2 ** 0.5, 1.0 / fan_c2 ** 0.5),
    }

    out = jax.jit(upsample_add_forward)(x1, x2, params)
    out = jax.block_until_ready(out)

    ref = reference_forward(x1, x2, params)
    assert out.shape == (N, C, 2 * H, 2 * W), out.shape
    # bf16 MXU inputs (f32 accumulation) -> slightly relaxed tolerance vs f32 reference
    assert jnp.allclose(out, ref, atol=3e-2, rtol=3e-2), float(jnp.max(jnp.abs(out - ref)))

    print("KERNEL_OK")
</pallas_src>

<mosaic_0001>
module attributes {stable_mosaic.version = 11 : i64} {
  func.func @_upconv_gemm_kernel(%arg0: i32, %arg1: memref<64x4xbf16, #tpu.memory_space<vmem>>, %arg2: memref<4x64xbf16, #tpu.memory_space<vmem>>, %arg3: memref<64x64xf32, #tpu.memory_space<vmem>>) attributes {dimension_semantics = [#tpu.dimension_semantics<parallel>], iteration_bounds = array<i64: 2>, scalar_prefetch = 0 : i64, scratch_operands = 0 : i64, tpu.core_type = #tpu.core_type<tc>, window_params = [{transform_indices = @transform_0, window_bounds = array<i64: 64, 4>}, {pipeline_mode = #tpu.pipeline_mode<synchronous>, transform_indices = @transform_1, window_bounds = array<i64: 4, 64>}, {transform_indices = @transform_2, window_bounds = array<i64: 64, 64>}]} {
    %c0 = arith.constant 0 : index
    %c0_0 = arith.constant 0 : index
    %0 = vector.load %arg1[%c0, %c0_0] : memref<64x4xbf16, #tpu.memory_space<vmem>>, vector<64x4xbf16>
    %c0_1 = arith.constant 0 : index
    %c0_2 = arith.constant 0 : index
    %1 = vector.load %arg2[%c0_1, %c0_2] : memref<4x64xbf16, #tpu.memory_space<vmem>>, vector<4x64xbf16>
    %cst = arith.constant dense<0.000000e+00> : vector<64x64xf32>
    %2 = tpu.matmul %0, %1, %cst {dimension_numbers = #tpu.dot_dimension_numbers<[1], [0], [0], [1], [0, 0, 1, 1], [], []>} : vector<64x4xbf16>, vector<4x64xbf16>, vector<64x64xf32> -> vector<64x64xf32>
    %c0_3 = arith.constant 0 : index
    %c0_4 = arith.constant 0 : index
    %3 = vector.load %arg3[%c0_3, %c0_4] : memref<64x64xf32, #tpu.memory_space<vmem>>, vector<64x64xf32>
    tpu.vector_store %arg3[%c0_3, %c0_4], %2 {strides = array<i32>} : memref<64x64xf32, #tpu.memory_space<vmem>>, vector<64x64xf32>,
    return
  }
  func.func @transform_0(%arg0: i32) -> (i32, i32) {
    %c0_i32 = arith.constant 0 : i32
    %c0_i32_0 = arith.constant 0 : i32
    return %arg0, %c0_i32 : i32, i32
  }
  func.func @transform_1(%arg0: i32) -> (i32, i32) {
    %c0_i32 = arith.constant 0 : i32
    %c0_i32_0 = arith.constant 0 : i32
    %c0_i32_1 = arith.constant 0 : i32
    return %c0_i32, %c0_i32_0 : i32, i32
  }
  func.func @transform_2(%arg0: i32) -> (i32, i32) {
    %c0_i32 = arith.constant 0 : i32
    %c0_i32_0 = arith.constant 0 : i32
    return %arg0, %c0_i32 : i32, i32
  }
}

module attributes {stable_mosaic.version = 11 : i64} {
  func.func @_fused_cat_conv3_kernel(%arg0: i32, %arg1: i32, %arg2: i32, %arg3: memref<1x1x18x4xbf16, #tpu.memory_space<vmem>>, %arg4: memref<1x1x18x4xbf16, #tpu.memory_space<vmem>>, %arg5: memref<3x3x4x4xbf16, #tpu.memory_space<vmem>>, %arg6: memref<3x3x4x4xbf16, #tpu.memory_space<vmem>>, %arg7: memref<1x4xf32, #tpu.memory_space<vmem>>, %arg8: memref<1x1x16x4xf32, #tpu.memory_space<vmem>>, %arg9: memref<16x4xf32, #tpu.memory_space<vmem>>) attributes {dimension_semantics = [#tpu.dimension_semantics<parallel>, #tpu.dimension_semantics<parallel>, #tpu.dimension_semantics<arbitrary>], iteration_bounds = array<i64: 2, 16, 3>, scalar_prefetch = 0 : i64, scratch_operands = 1 : i64, tpu.core_type = #tpu.core_type<tc>, window_params = [{transform_indices = @transform_0, window_bounds = array<i64: 1, 1, 18, 4>}, {transform_indices = @transform_1, window_bounds = array<i64: 1, 1, 18, 4>}, {pipeline_mode = #tpu.pipeline_mode<synchronous>, transform_indices = @transform_2, window_bounds = array<i64: 3, 3, 4, 4>}, {pipeline_mode = #tpu.pipeline_mode<synchronous>, transform_indices = @transform_3, window_bounds = array<i64: 3, 3, 4, 4>}, {pipeline_mode = #tpu.pipeline_mode<synchronous>, transform_indices = @transform_4, window_bounds = array<i64: 1, 4>}, {transform_indices = @transform_5, window_bounds = array<i64: 1, 1, 16, 4>}]} {
    %c0_i32 = arith.constant 0 : i32
    %0 = arith.cmpi eq, %arg2, %c0_i32 : i32
    %1 = arith.extui %0 : i1 to i32
    %c0_i32_0 = arith.constant 0 : i32
    %2 = arith.cmpi ne, %1, %c0_i32_0 : i32
    scf.if %2 {
      %cst_34 = arith.constant 0.000000e+00 : f32
      %48 = vector.broadcast %cst_34 : f32 to vector<16x4xf32>
      %c0_35 = arith.constant 0 : index
      %c0_36 = arith.constant 0 : index
      %49 = vector.load %arg9[%c0_35, %c0_36] : memref<16x4xf32, #tpu.memory_space<vmem>>, vector<16x4xf32>
      tpu.vector_store %arg9[%c0_35, %c0_36], %48 {strides = array<i32>} : memref<16x4xf32, #tpu.memory_space<vmem>>, vector<16x4xf32>,
    } else {
    }
    %c0 = arith.constant 0 : index
    %c0_1 = arith.constant 0 : index
    %c0_2 = arith.constant 0 : index
    %c0_3 = arith.constant 0 : index
    %3 = vector.load %arg3[%c0, %c0_1, %c0_2, %c0_3] : memref<1x1x18x4xbf16, #tpu.memory_space<vmem>>, vector<1x1x18x4xbf16>
    %4 = vector.shape_cast %3 : vector<1x1x18x4xbf16> to vector<18x4xbf16>
    %c0_4 = arith.constant 0 : index
    %c0_5 = arith.constant 0 : index
    %c0_6 = arith.constant 0 : index
    %c0_7 = arith.constant 0 : index
    %5 = vector.load %arg4[%c0_4, %c0_5, %c0_6, %c0_7] : memref<1x1x18x4xbf16, #tpu.memory_space<vmem>>, vector<1x1x18x4xbf16>
    %6 = vector.shape_cast %5 : vector<1x1x18x4xbf16> to vector<18x4xbf16>
    %c0_8 = arith.constant 0 : index
    %c0_9 = arith.constant 0 : index
    %7 = vector.load %arg9[%c0_8, %c0_9] : memref<16x4xf32, #tpu.memory_space<vmem>>, vector<16x4xf32>
    %8 = vector.extract_strided_slice %4 {offsets = [0, 0], sizes = [16, 4], strides = [1, 1]} : vector<18x4xbf16> to vector<16x4xbf16>
    %9 = arith.index_cast %arg2 : i32 to index
    %c0_10 = arith.constant 0 : index
    %c0_11 = arith.constant 0 : index
    %c0_12 = arith.constant 0 : index
    %10 = vector.load %arg5[%9, %c0_10, %c0_11, %c0_12] : memref<3x3x4x4xbf16, #tpu.memory_space<vmem>>, vector<1x1x4x4xbf16>
    %11 = vector.shape_cast %10 : vector<1x1x4x4xbf16> to vector<4x4xbf16>
    %cst = arith.constant dense<0.000000e+00> : vector<16x4xf32>
    %12 = tpu.matmul %8, %11, %cst {dimension_numbers = #tpu.dot_dimension_numbers<[1], [0], [0], [1], [0, 0, 1, 1], [], []>} : vector<16x4xbf16>, vector<4x4xbf16>, vector<16x4xf32> -> vector<16x4xf32>
    %13 = arith.addf %7, %12 : vector<16x4xf32>
    %14 = vector.extract_strided_slice %6 {offsets = [0, 0], sizes = [16, 4], strides = [1, 1]} : vector<18x4xbf16> to vector<16x4xbf16>
    %15 = arith.index_cast %arg2 : i32 to index
    %c0_13 = arith.constant 0 : index
    %c0_14 = arith.constant 0 : index
    %c0_15 = arith.constant 0 : index
    %16 = vector.load %arg6[%15, %c0_13, %c0_14, %c0_15] : memref<3x3x4x4xbf16, #tpu.memory_space<vmem>>, vector<1x1x4x4xbf16>
    %17 = vector.shape_cast %16 : vector<1x1x4x4xbf16> to vector<4x4xbf16>
    %cst_16 = arith.constant dense<0.000000e+00> : vector<16x4xf32>
    %18 = tpu.matmul %14, %17, %cst_16 {dimension_numbers = #tpu.dot_dimension_numbers<[1], [0], [0], [1], [0, 0, 1, 1], [], []>} : vector<16x4xbf16>, vector<4x4xbf16>, vector<16x4xf32> -> vector<16x4xf32>
    %19 = arith.addf %13, %18 : vector<16x4xf32>
    %20 = vector.extract_strided_slice %4 {offsets = [1, 0], sizes = [16, 4], strides = [1, 1]} : vector<18x4xbf16> to vector<16x4xbf16>
    %21 = arith.index_cast %arg2 : i32 to index
    %c1 = arith.constant 1 : index
    %c0_17 = arith.constant 0 : index
    %c0_18 = arith.constant 0 : index
    %22 = vector.load %arg5[%21, %c1, %c0_17, %c0_18] : memref<3x3x4x4xbf16, #tpu.memory_space<vmem>>, vector<1x1x4x4xbf16>
    %23 = vector.shape_cast %22 : vector<1x1x4x4xbf16> to vector<4x4xbf16>
    %cst_19 = arith.constant dense<0.000000e+00> : vector<16x4xf32>
    %24 = tpu.matmul %20, %23, %cst_19 {dimension_numbers = #tpu.dot_dimension_numbers<[1], [0], [0], [1], [0, 0, 1, 1], [], []>} : vector<16x4xbf16>, vector<4x4xbf16>, vector<16x4xf32> -> vector<16x4xf32>
    %25 = arith.addf %19, %24 : vector<16x4xf32>
    %26 = vector.extract_strided_slice %6 {offsets = [1, 0], sizes = [16, 4], strides = [1, 1]} : vector<18x4xbf16> to vector<16x4xbf16>
    %27 = arith.index_cast %arg2 : i32 to index
    %c1_20 = arith.constant 1 : index
    %c0_21 = arith.constant 0 : index
    %c0_22 = arith.constant 0 : index
    %28 = vector.load %arg6[%27, %c1_20, %c0_21, %c0_22] : memref<3x3x4x4xbf16, #tpu.memory_space<vmem>>, vector<1x1x4x4xbf16>
    %29 = vector.shape_cast %28 : vector<1x1x4x4xbf16> to vector<4x4xbf16>
    %cst_23 = arith.constant dense<0.000000e+00> : vector<16x4xf32>
    %30 = tpu.matmul %26, %29, %cst_23 {dimension_numbers = #tpu.dot_dimension_numbers<[1], [0], [0], [1], [0, 0, 1, 1], [], []>} : vector<16x4xbf16>, vector<4x4xbf16>, vector<16x4xf32> -> vector<16x4xf32>
    %31 = arith.addf %25, %30 : vector<16x4xf32>
    %32 = vector.extract_strided_slice %4 {offsets = [2, 0], sizes = [16, 4], strides = [1, 1]} : vector<18x4xbf16> to vector<16x4xbf16>
    %33 = arith.index_cast %arg2 : i32 to index
    %c2 = arith.constant 2 : index
    %c0_24 = arith.constant 0 : index
    %c0_25 = arith.constant 0 : index
    %34 = vector.load %arg5[%33, %c2, %c0_24, %c0_25] : memref<3x3x4x4xbf16, #tpu.memory_space<vmem>>, vector<1x1x4x4xbf16>
    %35 = vector.shape_cast %34 : vector<1x1x4x4xbf16> to vector<4x4xbf16>
    %cst_26 = arith.constant dense<0.000000e+00> : vector<16x4xf32>
    %36 = tpu.matmul %32, %35, %cst_26 {dimension_numbers = #tpu.dot_dimension_numbers<[1], [0], [0], [1], [0, 0, 1, 1], [], []>} : vector<16x4xbf16>, vector<4x4xbf16>, vector<16x4xf32> -> vector<16x4xf32>
    %37 = arith.addf %31, %36 : vector<16x4xf32>
    %38 = vector.extract_strided_slice %6 {offsets = [2, 0], sizes = [16, 4], strides = [1, 1]} : vector<18x4xbf16> to vector<16x4xbf16>
    %39 = arith.index_cast %arg2 : i32 to index
    %c2_27 = arith.constant 2 : index
    %c0_28 = arith.constant 0 : index
    %c0_29 = arith.constant 0 : index
    %40 = vector.load %arg6[%39, %c2_27, %c0_28, %c0_29] : memref<3x3x4x4xbf16, #tpu.memory_space<vmem>>, vector<1x1x4x4xbf16>
    %41 = vector.shape_cast %40 : vector<1x1x4x4xbf16> to vector<4x4xbf16>
    %cst_30 = arith.constant dense<0.000000e+00> : vector<16x4xf32>
    %42 = tpu.matmul %38, %41, %cst_30 {dimension_numbers = #tpu.dot_dimension_numbers<[1], [0], [0], [1], [0, 0, 1, 1], [], []>} : vector<16x4xbf16>, vector<4x4xbf16>, vector<16x4xf32> -> vector<16x4xf32>
    %43 = arith.addf %37, %42 : vector<16x4xf32>
    %c0_31 = arith.constant 0 : index
    %c0_32 = arith.constant 0 : index
    %44 = vector.load %arg9[%c0_31, %c0_32] : memref<16x4xf32, #tpu.memory_space<vmem>>, vector<16x4xf32>
    tpu.vector_store %arg9[%c0_31, %c0_32], %43 {strides = array<i32>} : memref<16x4xf32, #tpu.memory_space<vmem>>, vector<16x4xf32>,
    %c2_i32 = arith.constant 2 : i32
    %45 = arith.cmpi eq, %arg2, %c2_i32 : i32
    %46 = arith.extui %45 : i1 to i32
    %c0_i32_33 = arith.constant 0 : i32
    %47 = arith.cmpi ne, %46, %c0_i32_33 : i32
    scf.if %47 {
      %c0_34 = arith.constant 0 : index
      %c0_35 = arith.constant 0 : index
      %48 = vector.load %arg9[%c0_34, %c0_35] : memref<16x4xf32, #tpu.memory_space<vmem>>, vector<16x4xf32>
      %c0_36 = arith.constant 0 : index
      %c0_37 = arith.constant 0 : index
      %49 = vector.load %arg7[%c0_36, %c0_37] : memref<1x4xf32, #tpu.memory_space<vmem>>, vector<1x4xf32>
      %50 = vector.broadcast %49 : vector<1x4xf32> to vector<16x4xf32>
      %51 = arith.addf %48, %50 : vector<16x4xf32>
      %c0_38 = arith.constant 0 : index
      %c0_39 = arith.constant 0 : index
      %c0_40 = arith.constant 0 : index
      %c0_41 = arith.constant 0 : index
      %52 = vector.load %arg8[%c0_38, %c0_39, %c0_40, %c0_41] : memref<1x1x16x4xf32, #tpu.memory_space<vmem>>, vector<1x1x16x4xf32>
      %53 = vector.shape_cast %52 : vector<1x1x16x4xf32> to vector<16x4xf32>
      %54 = vector.shape_cast %51 : vector<16x4xf32> to vector<1x1x16x4xf32>
      tpu.vector_store %arg8[%c0_38, %c0_39, %c0_40, %c0_41], %54 {strides = array<i32>} : memref<1x1x16x4xf32, #tpu.memory_space<vmem>>, vector<1x1x16x4xf32>,
    } else {
    }
    return
  }
  func.func @transform_0(%arg0: i32, %arg1: i32, %arg2: i32) -> (i32, i32, i32, i32) {
    %0 = arith.addi %arg1, %arg2 : i32
    %c0_i32 = arith.constant 0 : i32
    %c0_i32_0 = arith.constant 0 : i32
    %c0_i32_1 = arith.constant 0 : i32
    return %arg0, %0, %c0_i32, %c0_i32_0 : i32, i32, i32, i32
  }
  func.func @transform_1(%arg0: i32, %arg1: i32, %arg2: i32) -> (i32, i32, i32, i32) {
    %0 = arith.addi %arg1, %arg2 : i32
    %c0_i32 = arith.constant 0 : i32
    %c0_i32_0 = arith.constant 0 : i32
    %c0_i32_1 = arith.constant 0 : i32
    return %arg0, %0, %c0_i32, %c0_i32_0 : i32, i32, i32, i32
  }
  func.func @transform_2(%arg0: i32, %arg1: i32, %arg2: i32) -> (i32, i32, i32, i32) {
    %c0_i32 = arith.constant 0 : i32
    %c0_i32_0 = arith.constant 0 : i32
    %c0_i32_1 = arith.constant 0 : i32
    %c0_i32_2 = arith.constant 0 : i32
    %c0_i32_3 = arith.constant 0 : i32
    return %c0_i32, %c0_i32_0, %c0_i32_1, %c0_i32_2 : i32, i32, i32, i32
  }
  func.func @transform_3(%arg0: i32, %arg1: i32, %arg2: i32) -> (i32, i32, i32, i32) {
    %c0_i32 = arith.constant 0 : i32
    %c0_i32_0 = arith.constant 0 : i32
    %c0_i32_1 = arith.constant 0 : i32
    %c0_i32_2 = arith.constant 0 : i32
    %c0_i32_3 = arith.constant 0 : i32
    return %c0_i32, %c0_i32_0, %c0_i32_1, %c0_i32_2 : i32, i32, i32, i32
  }
  func.func @transform_4(%arg0: i32, %arg1: i32, %arg2: i32) -> (i32, i32) {
    %c0_i32 = arith.constant 0 : i32
    %c0_i32_0 = arith.constant 0 : i32
    %c0_i32_1 = arith.constant 0 : i32
    return %c0_i32, %c0_i32_0 : i32, i32
  }
  func.func @transform_5(%arg0: i32, %arg1: i32, %arg2: i32) -> (i32, i32, i32, i32) {
    %c0_i32 = arith.constant 0 : i32
    %c0_i32_0 = arith.constant 0 : i32
    %c0_i32_1 = arith.constant 0 : i32
    return %arg0, %arg1, %c0_i32, %c0_i32_0 : i32, i32, i32, i32
  }
}

</mosaic_0001>

<bundles_post_ra>
// kernel: upsample_add_forward.2
= control target key start
LH: loop header
LB: loop body
LE: loop exit
PB: predicated region body
PF: predicated region fallthrough
CT: control target
= control target key end

     0   :  { %s397_s9 = smov 0   ;;  %s425_s0 = inlined_call_operand.vmem [shape: bf16[128,4], index: 0, kind: input, shape index: {}]   ;;  %s426_s1 = inlined_call_operand.vmem [shape: bf16[4,64], index: 1, kind: input, shape index: {}]   ;;  %s427_s2 = inlined_call_operand.vmem [shape: f32[128,64], index: 2, kind: output, shape index: {}]  }
   0x1 LB: > { %s324_s10 = sadd.s32 4294967295, %s380_s9   ;;  %p328_p0 = scmp.ge.s32.totalorder %s380_s9, 1  ;;  %s380_s9 = sphi %s397_s9, %s12_s9  }
   0x2   : > { %p113_p1 = scmp.lt.s32.totalorder %s380_s9, 3 }
   0x4   : > { %p114_p2 = pnand %p328_p0, %p113_p1 }
   0x5   : > { %v156_v0 = vld [vmem:[%s426_s1] sm:$0x3] (!%p114_p2)  ;;  %vm190_vm0 = vcmask (!%p114_p2), 1041408   ;;  %s329_s13 = sshll.u32 (!%p114_p2), %s324_s10, 3  ;;  %vm177_vm1 = vcmask (!%p114_p2), 31744   ;;  %vm259_vm2 = vcmask (!%p114_p2), 523264  }
   0x6   : > { %117 = sbr.rel (%p114_p2) target bundleno = 234 (0xea), region = 28  ;;  %360 = vmatprep.subr.msk.bf16.mxu0 (!%p114_p2), %vm190_vm0, %v156_v0  ;;  %361 = vmatprep.subr.msk.bf16.mxu1 (!%p114_p2), %vm190_vm0, %v156_v0  ;;  %v192_v1 = vsel (!%p114_p2), %vm190_vm0, %v156_v0, 0  ;;  %p136_p3 = scmp.lt.s32.totalorder (!%p114_p2), %s329_s13, 15 }
   0x7   : > { %349 = vmatpush3.bf16.msra.mxu0 (!%p114_p2), %v192_v1  ;;  %359 = vmatpush3.bf16.msra.mxu1 (!%p114_p2), %v192_v1 }
   0xd   : > { %s429_s13 = smov (!%p136_p3, %s329_s13), 15 }
   0xe   : > { %s330_s14 = sshll.u32 %s429_s13, 2  ;;  %s332_s18 = sshll.u32 %s429_s13, 3 }
   0xf   : > { %s139_s17 = scalar_lea.vmem %s425_s0, %s330_s14  ;;  %s145_s21 = scalar_lea.vmem %s427_s2, %s332_s18 }
  0x10   : > { %v370_v2 = vld [vmem:[%s139_s17] sm:$0xff]   ;;  %v371_v3 = vld [vmem:[%s139_s17 + $0x10] sm:$0xff]   ;;  %v372_v4 = vld [vmem:[%s139_s17 + $0x8] sm:$0xff]  }
  0x11   : > { %350 = vmatprep.mubr.msk.bf16.mxu0 %vm177_vm1, %v370_v2  ;;  %354 = vmatprep.mubr.msk.bf16.mxu1 %vm177_vm1, %v371_v3  ;;  %v373_v5 = vld [vmem:[%s139_s17 + $0x18] sm:$0xff]  }
  0x12   : > { %351 = vmatmul.mubr.msk.bf16.vlgmr.msra.gmra.mrb[0].mxu0 %vm177_vm1, %v372_v4  ;;  %355 = vmatmul.mubr.msk.bf16.vlgmr.msra.gmra.mrb[0].mxu1 %vm177_vm1, %v373_v5 }
  0xe5   : > { %v352_v6 = vpop.f32.mrb[0].mxu0  ;;  %v356_v7 = vpop.f32.mrb[0].mxu1 }
  0xe6   : > { %262 = vst.msk [vmem:[%s145_s21 + $0x10] sm:$0xff] %vm259_vm2, %v352_v6  ;;  %v228_v8 = vpop.f32.mrb[1].mxu0  ;;  %266 = vst.msk [vmem:[%s145_s21 + $0x30] sm:$0xff] %vm259_vm2, %v356_v7  ;;  %v244_v9 = vpop.f32.mrb[1].mxu1 }
  0xe7   : > { %260 = vst.msk [vmem:[%s145_s21] sm:$0xff] %vm259_vm2, %v228_v8  ;;  %v353_v10 = vpop.f32.mrb[2].mxu0  ;;  %264 = vst.msk [vmem:[%s145_s21 + $0x20] sm:$0xff] %vm259_vm2, %v244_v9  ;;  %v357_v11 = vpop.f32.mrb[2].mxu1 }
  0xe8   : > { %263 = vst.msk [vmem:[%s145_s21 + $0x18] sm:$0xff] %vm259_vm2, %v353_v10  ;;  %v231_v12 = vpop.f32.mrb[3].mxu0  ;;  %267 = vst.msk [vmem:[%s145_s21 + $0x38] sm:$0xff] %vm259_vm2, %v357_v11  ;;  %v247_v13 = vpop.f32.mrb[3].mxu1 }
  0xe9   : > { %261 = vst.msk [vmem:[%s145_s21 + $0x8] sm:$0xff] %vm259_vm2, %v231_v12  ;;  %265 = vst.msk [vmem:[%s145_s21 + $0x28] sm:$0xff] %vm259_vm2, %v247_v13 }
  0xea PF: > { %s12_s9 = sadd.s32 1, %s380_s9  }
  0xeb   : > { %p9_p4 = scmp.ge.s32.totalorder %s12_s9, 4  }
  0xed   :  { %11 = sbr.rel (!%p9_p4) target bundleno = 1 (0x1), region = 58 }

// kernel: upsample_add_forward.3
= control target key start
LH: loop header
LB: loop body
LE: loop exit
PB: predicated region body
PF: predicated region fallthrough
CT: control target
= control target key end

     0   :  { %s1115_s18 = smov 0   ;;  %s1117_s19 = smov 0   ;;  %s1250_s0 = inlined_call_operand.vmem [shape: bf16[2,18,18,4], index: 0, kind: input, shape index: {}]   ;;  %s1251_s1 = inlined_call_operand.vmem [shape: bf16[2,18,18,4], index: 1, kind: input, shape index: {}]   ;;  %s1252_s2 = inlined_call_operand.vmem [shape: bf16[3,3,4,4], index: 2, kind: input, shape index: {}]   ;;  %s1253_s3 = inlined_call_operand.vmem [shape: bf16[3,3,4,4], index: 3, kind: input, shape index: {}]   ;;  %s1254_s4 = inlined_call_operand.vmem [shape: f32[1,4], index: 4, kind: input, shape index: {}]   ;;  %s1255_s5 = inlined_call_operand.vmem [shape: f32[2,16,16,4], index: 5, kind: output, shape index: {}]  }
   0x1   :  { %s1119_s20 = smov 0   ;;  %s1121_s21 = smov 0  }
   0x2   :  { %s1123_s22 = smov 0   ;;  %s1125_s23 = smov 0  }
   0x3   :  { %s1127_s24 = smov 0  }
   0x4 LB: > { %s27_s25 = sadd.s32 1, %s1068_s21  ;;  %s30_s26 = sadd.s32 1, %s1072_s22  ;;  %s1080_s24 = sphi %s1127_s24, %s15_s24   ;;  %s1076_s23 = sphi %s1125_s23, %s1265_s23   ;;  %s1072_s22 = sphi %s1123_s22, %s1264_s22   ;;  %s1068_s21 = sphi %s1121_s21, %s1263_s21   ;;  %s1064_s20 = sphi %s1119_s20, %s1262_s20   ;;  %s1060_s19 = sphi %s1117_s19, %s1261_s19   ;;  %s1056_s18 = sphi %s1115_s18, %s1260_s18  }
   0x5   : > { %p28_p0 = scmp.ge.s32.totalorder %s27_s25, 3  ;;  %p860_p1 = scmp.ge.s32.totalorder %s1080_s24, 1 }
   0x6   : > { %p238_p2 = scmp.lt.s32.totalorder %s1080_s24, 97  ;;  %s34_s27 = sadd.s32 1, %s1076_s23 }
   0x7   : > { %s1267_s25 = smov (%p28_p0, %s27_s25), 0  ;;  %s1269_s26 = smov (!%p28_p0, %s30_s26), %s1072_s22 }
   0x8   : > { %p239_p3 = pnand %p860_p1, %p238_p2  ;;  %p32_p4 = scmp.ge.s32.totalorder %s1269_s26, 16 }
   0x9   : > { %s285_s28 = sadd.s32 (!%p239_p3), %s1056_s18, %s1060_s19  ;;  %p286_p6 = scmp.lt.s32.totalorder (!%p239_p3), %s1064_s20, 1 }
   0xa   : > { %s1271_s26 = smov (%p32_p4, %s1269_s26), 0  ;;  %s1273_s27 = smov (!%p32_p4, %s34_s27), %s1076_s23 }
   0xb   : > { %1256 = sst [smem:[#allocation3_spill]] %s1271_s26  ;;  %p36_p5 = scmp.ge.s32.totalorder %s1273_s27, 2 }
   0xc   : > { %242 = sbr.rel (%p239_p3) target bundleno = 290 (0x122), region = 40  ;;  %p288_p7 = scmp.lt.s32.totalorder (!%p239_p3), %s285_s28, 17 }
   0xd   : > { %s1275_s27 = smov (%p36_p5, %s1273_s27), 0  ;;  %p309_p8 = scmp.lt.s32.totalorder (!%p239_p3), %s1060_s19, 15 }
   0xe   : > { %1257 = sst [smem:[#allocation4_spill]] %s1275_s27  ;;  %p866_p9 = scmp.ne.s32.totalorder (!%p239_p3), %s1056_s18, 0 }
  0x13   : > { %s1277_s20 = smov (!%p286_p6, %s1064_s20), 1  ;;  %s1279_s28 = smov (!%p288_p7, %s285_s28), 17 }
  0x14   : > { %s962_s29 = smul.u32 54, %s1277_s20  ;;  %s1281_s19 = smov (!%p309_p8, %s1060_s19), 15  ;;  %vm321_vm0 = vcmask (!%p866_p9), 31744   ;;  %v1082_v0 = vmov (!%p866_p9), 0.0  }
  0x15   : > { %s961_s30 = smul.u32 3, %s1279_s28  ;;  %s864_s7 = sshll.u32 %s1277_s20, 5  ;;  %322 = vst.msk [vmem:[#allocation2] sm:$0xff] (!%p866_p9), %vm321_vm0, %v1082_v0  ;;  %323 = vst.msk [vmem:[#allocation2 + $0x8] sm:$0xff] (!%p866_p9), %vm321_vm0, %v1082_v0 }
  0x16   : > { %s863_s9 = sshll.u32 %s1281_s19, 1  ;;  %320 = sbr.rel (%p866_p9) target bundleno = 29 (0x1d), region = 44 }
  0x17   : > { %s292_s6 = sadd.s32 %s962_s29, %s961_s30  ;;  %s313_s16 = sadd.s32 %s864_s7, %s863_s9 }
  0x18   : > { %s861_s8 = sshll.u32 %s292_s6, 2  ;;  %s865_s17 = sshll.u32 %s313_s16, 3 }
  0x19   : > { %s1163_s12 = scalar_lea.vmem %s1250_s0, %s861_s8  ;;  %s1168_s15 = scalar_lea.vmem %s1251_s1, %s861_s8 }
  0x1a   : > { %s1173_s28 = scalar_lea.vmem %s1255_s5, %s865_s17 }
  0x1d PF: > { %s891_s19 = smul.u32 6, %s1056_s18  ;;  %v1083_v1 = vmov 0.0   ;;  %vm345_vm1 = vcmask 1041408   ;;  %vm1084_vm2 = vmmov 0   ;;  %v1023_v2 = vld [vmem:[%s1168_s15] sm:$0xff]   ;;  %vm341_vm3 = vcmask 31744  }
  0x1e   : > { %905 = vmatprep.subr.bf16.mxu1 %v1083_v1  ;;  %923 = vmatprep.subr.bf16.mxu0 %v1083_v1  ;;  %v1022_v8 = vld [vmem:[%s1163_s12] sm:$0xff]   ;;  %v1024_v9 = vld [vmem:[%s1168_s15 + $0x8] ss:$0 sps:$4 sm:$0x11]   ;;  %v523_v10 = vshrl.u32 %v1023_v2, 16  ;;  %v525_v11 = vshll.u32 %v1023_v2, 16 }
  0x1f   : > { %s1180_s27 = scalar_lea.vmem %s1252_s2, %s891_s19  ;;  %907 = vmatprep.mubr.msk.bf16.mxu1 %vm1084_vm2, %v1083_v1  ;;  %s1186_s6 = scalar_lea.vmem %s1253_s3, %s891_s19  ;;  %925 = vmatprep.mubr.msk.bf16.mxu0 %vm1084_vm2, %v1083_v1  ;;  %v530_v14 = vshll.u32 %v1024_v9, 16  ;;  %vm456_vm4 = vsmask.f32 7424  ;;  %v1025_v20 = vld [vmem:[%s1163_s12 + $0x8] ss:$0 sps:$4 sm:$0x11]  }
  0x20   : > { %v335_v3 = vld [vmem:[%s1180_s27] sm:$0x3]  ;;  %v878_v4 = vld [vmem:[%s1186_s6 + $0x2] sm:$0x3]  ;;  %v527_v13 = vrot.slane %v525_v11, 1  ;;  %v588_v22 = vrot.slane %v1022_v8, 1 }
  0x21   : > { %v394_v5 = vld [vmem:[%s1186_s6] sm:$0x3]  ;;  %v347_v6 = vsel %vm345_vm1, %v335_v3, 0  ;;  %v538_v7 = vsel %vm345_vm1, %v878_v4, 0  ;;  %v882_v15 = vld [vmem:[%s1180_s27 + $0x4] sm:$0x3] }
  0x22   : > { %906 = vmatpush3.bf16.msra.mxu1 %v347_v6  ;;  %924 = vmatpush3.bf16.msra.mxu0 %v538_v7  ;;  %v404_v12 = vsel %vm345_vm1, %v394_v5, 0  ;;  %v528_v16 = vor.u32 %v527_v13, %v523_v10  ;;  %v532_v17 = vrot.slane %v530_v14, 1  ;;  %v595_v18 = vsel %vm345_vm1, %v882_v15, 0  ;;  %v874_v21 = vld [vmem:[%s1180_s27 + $0x2] sm:$0x3]  ;;  %v331_v40 = vld [vmem:[#allocation2 + $0x8] sm:$0xff] }
  0x23   : > { %911 = vmatprep.subr.bf16.mxu1 %v1083_v1  ;;  %929 = vmatprep.subr.bf16.mxu0 %v1083_v1  ;;  %v589_v23 = vrot.slane %v1025_v20, 1  ;;  %v459_v24 = vshll.u32 %v1022_v8, 16  ;;  %v472_v25 = vsel %vm345_vm1, %v874_v21, 0  ;;  %vm587_vm5 = vcmask 1046528   ;;  %v885_v26 = vld [vmem:[%s1186_s6 + $0x4] sm:$0x3] }
  0x24   : > { %v533_v19 = vsel %vm456_vm4, %v528_v16, %v532_v17  ;;  %v457_v28 = vshrl.u32 %v1022_v8, 16  ;;  %v464_v30 = vshll.u32 %v1025_v20, 16  ;;  %v650_v31 = vsel %vm345_vm1, %v885_v26, 0  ;;  %v330_v38 = vld [vmem:[#allocation2] sm:$0xff]  ;;  %p887_p10 = scmp.ne.s32.totalorder %s1056_s18, 2 }
  0x25   : > { %908 = vmatmul.mubr.msk.bf16.vlgmr.msra.gmra.mrb[0].mxu1 %vm341_vm3, %v1022_v8  ;;  %926 = vmatmul.mubr.msk.bf16.vlgmr.msra.gmra.mrb[0].mxu0 %vm341_vm3, %v533_v19  ;;  %v590_v27 = vsel %vm587_vm5, %v588_v22, %v589_v23  ;;  %v461_v29 = vrot.slane %v459_v24, 1  ;;  %v643_v35 = vrot.slane %v1023_v2, 1  ;;  %v644_v36 = vrot.slane %v1024_v9, 1  ;;  %v888_v53 = vld [vmem:[%s1254_s4] ss:$0 sm:$0xff] (!%p887_p10) }
  0x26   : > { %912 = vmatpush3.bf16.msra.mxu1 %v404_v12  ;;  %913 = vmatprep.mubr.msk.bf16.mxu1 %vm1084_vm2, %v1083_v1  ;;  %v466_v33 = vrot.slane %v464_v30, 1 }
  0x27   : > { %917 = vmatprep.subr.bf16.mxu1 %v1083_v1  ;;  %930 = vmatpush3.bf16.msra.mxu0 %v595_v18  ;;  %v462_v32 = vor.u32 %v461_v29, %v457_v28  ;;  %v645_v37 = vsel %vm587_vm5, %v643_v35, %v644_v36 }
  0x28   : > { %931 = vmatprep.mubr.msk.bf16.mxu0 %vm1084_vm2, %v1083_v1  ;;  %935 = vmatprep.subr.bf16.mxu0 %v1083_v1 }
  0x29   : > { %v467_v34 = vsel %vm456_vm4, %v462_v32, %v466_v33 }
  0x31   : > { %914 = vmatmul.mubr.msk.bf16.vlgmr.msra.gmra.mrb[0].mxu1 %vm341_vm3, %v1023_v2  ;;  %932 = vmatmul.mubr.msk.bf16.vlgmr.msra.gmra.mrb[0].mxu0 %vm341_vm3, %v590_v27 }
  0x32   : > { %918 = vmatpush3.bf16.msra.mxu1 %v472_v25  ;;  %919 = vmatprep.mubr.msk.bf16.mxu1 %vm1084_vm2, %v1083_v1 }
  0x33   : > { %936 = vmatpush3.bf16.msra.mxu0 %v650_v31  ;;  %937 = vmatprep.mubr.msk.bf16.mxu0 %vm1084_vm2, %v1083_v1 }
  0x3d   : > { %920 = vmatmul.mubr.msk.bf16.vlgmr.msra.gmra.mrb[0].mxu1 %vm341_vm3, %v467_v34  ;;  %938 = vmatmul.mubr.msk.bf16.vlgmr.msra.gmra.mrb[0].mxu0 %vm341_vm3, %v645_v37 }
 0x110   : > { %v508_v39 = vpop.f32.mrb[0].mxu1  ;;  %v686_v46 = vpop.f32.mrb[0].mxu0 }
 0x111   : > { %v941_v41 = vadd.f32 %v508_v39, %v330_v38  ;;  %v921_v42 = vpop.f32.mrb[1].mxu1  ;;  %v939_v48 = vpop.f32.mrb[1].mxu0  ;;  %700 = sbr.rel (%p887_p10) target bundleno = 290 (0x122), region = 48 }
 0x112   : > { %v511_v43 = vpop.f32.mrb[2].mxu1  ;;  %v689_v49 = vpop.f32.mrb[2].mxu0 }
 0x113   : > { %v943_v44 = vadd.f32 %v511_v43, %v331_v40  ;;  %v922_v45 = vpop.f32.mrb[3].mxu1  ;;  %v942_v47 = vadd.f32 %v941_v41, %v686_v46  ;;  %v940_v51 = vpop.f32.mrb[3].mxu0 }
 0x115   : > { %695 = vst.msk [vmem:[#allocation2] sm:$0xff] %vm341_vm3, %v942_v47  ;;  %v944_v50 = vadd.f32 %v943_v44, %v689_v49 }
 0x117   : > { %696 = vst.msk [vmem:[#allocation2 + $0x8] sm:$0xff] %vm341_vm3, %v944_v50 }
 0x11c   : > { %v701_v52 = vld [vmem:[#allocation2] sm:$0xff] }
 0x11d   : > { %v710_v55 = vadd.f32 %v888_v53, %v701_v52 }
 0x11e   : > { %v702_v54 = vld [vmem:[#allocation2 + $0x8] sm:$0xff] }
 0x11f   : > { %v711_v56 = vadd.f32 %v888_v53, %v702_v54  ;;  %712 = vst.msk [vmem:[%s1173_s28] sm:$0xff] %vm341_vm3, %v710_v55 }
 0x121   : > { %713 = vst.msk [vmem:[%s1173_s28 + $0x8] sm:$0xff] %vm341_vm3, %v711_v56 }
 0x122 PF: > { %s15_s24 = sadd.s32 1, %s1080_s24   ;;  %s1258_s9 = sld [smem:[#allocation3_spill]] }
 0x123   : > { %p12_p11 = scmp.ge.s32.totalorder %s15_s24, 98   ;;  %s1259_s10 = sld [smem:[#allocation4_spill]] }
 0x124   : > { %s1260_s18 = smov %s1068_s21  ;;  %s1261_s19 = smov %s1072_s22 }
 0x125   : > { %s1262_s20 = smov %s1076_s23  ;;  %s1263_s21 = smov %s1267_s25 }
 0x126   :  { %14 = sbr.rel (!%p12_p11) target bundleno = 4 (0x4), region = 87 }
 0x128   : > { %s1264_s22 = smov %s1258_s9 }
 0x129   : > { %s1265_s23 = smov %s1259_s10 }

</bundles_post_ra>
